<compile_context>
chip_gen: v7x
topology: tpu7x:2x2x1
jax: 0.10.0
libtpu: 0.0.40
codegen_flags: <defaults>
</compile_context>

<pallas_src>
import jax
import jax.numpy as jnp
from jax import lax
from jax.experimental import pallas as pl
from jax.experimental.pallas import tpu as pltpu


def _round_up(x, m):
    return ((x + m - 1) // m) * m


def _choose_tiling(B, block_rows, min_grid_steps=2):
    """Pick a lane-dense batch tile (multiple of 128) minimizing tail padding."""
    min_steps = min_grid_steps if B > 128 else 1
    n_steps = max(pl.cdiv(B, block_rows), min_steps)
    blk = _round_up(pl.cdiv(B, n_steps), 128)
    n_steps = pl.cdiv(B, blk)
    return blk, n_steps * blk


def hybrid_multihead_kernel(xn_ref, xr_ref,
                            w1_ref, b1_ref, w2_ref, b2_ref,
                            wvb1_ref, bvb1_ref,
                            w3a_ref, w3b_ref, b3_ref,
                            out_ref):
    cdt = w1_ref.dtype  # matmul-input dtype (f32 or bf16); accumulation is f32

    xn = xn_ref[...]
    xr = xr_ref[...]

    # Shared trunk: (blk, dn) -> (blk, 128) -> (blk, 64)
    h = jnp.dot(xn, w1_ref[...], preferred_element_type=jnp.float32) + b1_ref[...]
    h = jnp.maximum(h, 0.0).astype(cdt)
    shared = jnp.dot(h, w2_ref[...], preferred_element_type=jnp.float32) + b2_ref[...]
    shared = jnp.maximum(shared, 0.0).astype(cdt)

    # vb branch: (blk, dr) -> (blk, 64)
    hv = jnp.dot(xr, wvb1_ref[...], preferred_element_type=jnp.float32) + bvb1_ref[...]
    hv = jnp.maximum(hv, 0.0).astype(cdt)

    # Heads, transposed output: (8, 64) x (blk, 64)^T -> (8, blk)
    # sublane 0 = kpl, 1 = kve, 2 = vb logit, 3..7 = 0
    dnums = (((1,), (1,)), ((), ()))
    y = (lax.dot_general(w3a_ref[...], shared, dnums,
                         preferred_element_type=jnp.float32)
         + lax.dot_general(w3b_ref[...], hv, dnums,
                           preferred_element_type=jnp.float32)
         + b3_ref[...])

    sub = lax.broadcasted_iota(jnp.int32, y.shape, 0)
    out_ref[...] = jnp.where(sub == 2, jax.nn.sigmoid(y), y)  # lane-dense store


def prepare_params(params, *, dtype=jnp.float32):
    """Pack params into kernel-ready arrays. Call ONCE at init, not per forward."""
    f32 = jnp.float32

    # Transposed head weights: rows 0/1 act on `shared`, row 2 acts on `hv`.
    w3a = jnp.zeros((8, 64), f32)
    w3a = w3a.at[0, :].set(params["wkpl"][:, 0])
    w3a = w3a.at[1, :].set(params["wkve"][:, 0])
    w3b = jnp.zeros((8, 64), f32)
    w3b = w3b.at[2, :].set(params["wvb2"][:, 0])

    b3 = jnp.zeros((8, 1), f32)
    b3 = b3.at[0, 0].set(params["bkpl"][0, 0])
    b3 = b3.at[1, 0].set(params["bkve"][0, 0])
    b3 = b3.at[2, 0].set(params["bvb2"][0, 0])

    return (params["w1"].astype(dtype), params["b1"].astype(f32),
            params["w2"].astype(dtype), params["b2"].astype(f32),
            params["wvb1"].astype(dtype), params["bvb1"].astype(f32),
            w3a.astype(dtype), w3b.astype(dtype), b3)


def hybrid_multihead(x_norm, x_raw, prepared, *, block_rows=2048, min_grid_steps=2):
    """Returns (B, 3) f32 = concat([kpl, kve, vb], axis=1)."""
    B, dn = x_norm.shape
    dr = x_raw.shape[1]
    w1, b1, w2, b2, wvb1, bvb1, w3a, w3b, b3 = prepared
    dtype = w1.dtype

    blk, b_pad = _choose_tiling(B, block_rows, min_grid_steps)

    xn = x_norm.astype(dtype)
    xr = x_raw.astype(dtype)
    if b_pad != B:
        xn = jnp.pad(xn, ((0, b_pad - B), (0, 0)))  # padded rows are zero
        xr = jnp.pad(xr, ((0, b_pad - B), (0, 0)))

    def resident(shape):  # grid-invariant block -> stays VMEM-resident
        return pl.BlockSpec(shape, lambda i: (0, 0))

    out_t = pl.pallas_call(
        hybrid_multihead_kernel,
        out_shape=jax.ShapeDtypeStruct((8, b_pad), jnp.float32),
        grid=(b_pad // blk,),
        in_specs=[
            pl.BlockSpec((blk, dn), lambda i: (i, 0)),   # x_norm: tiled over batch
            pl.BlockSpec((blk, dr), lambda i: (i, 0)),   # x_raw:  tiled over batch
            resident((dn, 128)), resident((1, 128)),     # w1, b1
            resident((128, 64)), resident((1, 64)),      # w2, b2
            resident((dr, 64)), resident((1, 64)),       # wvb1, bvb1
            resident((8, 64)), resident((8, 64)),        # w3a, w3b
            resident((8, 1)),                            # b3 (transposed bias)
        ],
        out_specs=pl.BlockSpec((8, blk), lambda i: (0, i)),  # transposed, lane-dense
        compiler_params=pltpu.CompilerParams(
            dimension_semantics=("parallel",)),
    )(xn, xr, w1, b1, w2, b2, wvb1, bvb1, w3a, w3b, b3)

    return out_t[:3, :B].T


def make_params(key, input_dim_raw, input_dim_norm):
    """Deterministic parameter init (weights stored as (in, out); biases as (1, out))."""
    ks = jax.random.split(key, 12)

    def w(k, fan_in, fan_out):
        bound = 1.0 / jnp.sqrt(fan_in)
        return jax.random.uniform(k, (fan_in, fan_out), jnp.float32, -bound, bound)

    def b(k, fan_in, fan_out):
        bound = 1.0 / jnp.sqrt(fan_in)
        return jax.random.uniform(k, (1, fan_out), jnp.float32, -bound, bound)

    return {
        "w1": w(ks[0], input_dim_norm, 128), "b1": b(ks[1], input_dim_norm, 128),
        "w2": w(ks[2], 128, 64),             "b2": b(ks[3], 128, 64),
        "wkpl": w(ks[4], 64, 1),             "bkpl": b(ks[5], 64, 1),
        "wkve": w(ks[6], 64, 1),             "bkve": b(ks[7], 64, 1),
        "wvb1": w(ks[8], input_dim_raw, 64), "bvb1": b(ks[9], input_dim_raw, 64),
        "wvb2": w(ks[10], 64, 1),            "bvb2": b(ks[11], 64, 1),
    }


def reference_forward(x_norm, x_raw, p):
    h = jnp.maximum(x_norm @ p["w1"] + p["b1"], 0.0)
    shared = jnp.maximum(h @ p["w2"] + p["b2"], 0.0)
    kpl = shared @ p["wkpl"] + p["bkpl"]
    kve = shared @ p["wkve"] + p["bkve"]
    hv = jnp.maximum(x_raw @ p["wvb1"] + p["bvb1"], 0.0)
    vb = jax.nn.sigmoid(hv @ p["wvb2"] + p["bvb2"])
    return jnp.concatenate([kpl, kve, vb], axis=1)


if __name__ == "__main__":
    key = jax.random.PRNGKey(0)
    k_params, k_norm, k_raw = jax.random.split(key, 3)

    batch = 8
    input_dim_norm = 32
    input_dim_raw = 16

    params = make_params(k_params, input_dim_raw, input_dim_norm)
    x_norm = jax.random.normal(k_norm, (batch, input_dim_norm), jnp.float32)
    x_raw = jax.random.normal(k_raw, (batch, input_dim_raw), jnp.float32)

    ref = reference_forward(x_norm, x_raw, params)

    # f32 path (exact semantics of the original module); weights packed once.
    prep_f32 = prepare_params(params, dtype=jnp.float32)
    out = jax.block_until_ready(hybrid_multihead(x_norm, x_raw, prep_f32))
    assert out.shape == (batch, 3), out.shape
    assert jnp.allclose(out, ref, atol=1e-5, rtol=1e-5), (out, ref)

    # bf16 matmul-input path (halves x/weight HBM bytes on v5e/v6e/v7x).
    prep_bf16 = prepare_params(params, dtype=jnp.bfloat16)
    out_bf16 = jax.block_until_ready(hybrid_multihead(x_norm, x_raw, prep_bf16))
    assert jnp.allclose(out_bf16, ref, atol=5e-2, rtol=5e-2), (out_bf16, ref)

    # Larger batch that exercises a multi-step grid and the padded tail.
    B2 = 300
    xn2 = jax.random.normal(jax.random.PRNGKey(1), (B2, input_dim_norm), jnp.float32)
    xr2 = jax.random.normal(jax.random.PRNGKey(2), (B2, input_dim_raw), jnp.float32)
    out2 = jax.block_until_ready(
        hybrid_multihead(xn2, xr2, prep_f32, block_rows=128))
    ref2 = reference_forward(xn2, xr2, params)
    assert out2.shape == (B2, 3)
    assert jnp.allclose(out2, ref2, atol=1e-5, rtol=1e-5)

    print("KERNEL_OK")
</pallas_src>

<mosaic_0001>
module attributes {stable_mosaic.version = 11 : i64} {
  func.func @hybrid_multihead_kernel(%arg0: i32, %arg1: memref<128x32xf32, #tpu.memory_space<vmem>>, %arg2: memref<128x16xf32, #tpu.memory_space<vmem>>, %arg3: memref<32x128xf32, #tpu.memory_space<vmem>>, %arg4: memref<1x128xf32, #tpu.memory_space<vmem>>, %arg5: memref<128x64xf32, #tpu.memory_space<vmem>>, %arg6: memref<1x64xf32, #tpu.memory_space<vmem>>, %arg7: memref<16x64xf32, #tpu.memory_space<vmem>>, %arg8: memref<1x64xf32, #tpu.memory_space<vmem>>, %arg9: memref<8x64xf32, #tpu.memory_space<vmem>>, %arg10: memref<8x64xf32, #tpu.memory_space<vmem>>, %arg11: memref<8x1xf32, #tpu.memory_space<vmem>>, %arg12: memref<8x128xf32, #tpu.memory_space<vmem>>) attributes {dimension_semantics = [#tpu.dimension_semantics<parallel>], iteration_bounds = array<i64: 1>, scalar_prefetch = 0 : i64, scratch_operands = 0 : i64, tpu.core_type = #tpu.core_type<tc>, window_params = [{transform_indices = @transform_0, window_bounds = array<i64: 128, 32>}, {transform_indices = @transform_1, window_bounds = array<i64: 128, 16>}, {pipeline_mode = #tpu.pipeline_mode<synchronous>, transform_indices = @transform_2, window_bounds = array<i64: 32, 128>}, {pipeline_mode = #tpu.pipeline_mode<synchronous>, transform_indices = @transform_3, window_bounds = array<i64: 1, 128>}, {pipeline_mode = #tpu.pipeline_mode<synchronous>, transform_indices = @transform_4, window_bounds = array<i64: 128, 64>}, {pipeline_mode = #tpu.pipeline_mode<synchronous>, transform_indices = @transform_5, window_bounds = array<i64: 1, 64>}, {pipeline_mode = #tpu.pipeline_mode<synchronous>, transform_indices = @transform_6, window_bounds = array<i64: 16, 64>}, {pipeline_mode = #tpu.pipeline_mode<synchronous>, transform_indices = @transform_7, window_bounds = array<i64: 1, 64>}, {pipeline_mode = #tpu.pipeline_mode<synchronous>, transform_indices = @transform_8, window_bounds = array<i64: 8, 64>}, {pipeline_mode = #tpu.pipeline_mode<synchronous>, transform_indices = @transform_9, window_bounds = array<i64: 8, 64>}, {pipeline_mode = #tpu.pipeline_mode<synchronous>, transform_indices = @transform_10, window_bounds = array<i64: 8, 1>}, {transform_indices = @transform_11, window_bounds = array<i64: 8, 128>}]} {
    %c0 = arith.constant 0 : index
    %c0_0 = arith.constant 0 : index
    %0 = vector.load %arg1[%c0, %c0_0] : memref<128x32xf32, #tpu.memory_space<vmem>>, vector<128x32xf32>
    %c0_1 = arith.constant 0 : index
    %c0_2 = arith.constant 0 : index
    %1 = vector.load %arg2[%c0_1, %c0_2] : memref<128x16xf32, #tpu.memory_space<vmem>>, vector<128x16xf32>
    %c0_3 = arith.constant 0 : index
    %c0_4 = arith.constant 0 : index
    %2 = vector.load %arg3[%c0_3, %c0_4] : memref<32x128xf32, #tpu.memory_space<vmem>>, vector<32x128xf32>
    %cst = arith.constant dense<0.000000e+00> : vector<128x128xf32>
    %3 = tpu.matmul %0, %2, %cst {dimension_numbers = #tpu.dot_dimension_numbers<[1], [0], [0], [1], [0, 0, 1, 1], [], []>} : vector<128x32xf32>, vector<32x128xf32>, vector<128x128xf32> -> vector<128x128xf32>
    %c0_5 = arith.constant 0 : index
    %c0_6 = arith.constant 0 : index
    %4 = vector.load %arg4[%c0_5, %c0_6] : memref<1x128xf32, #tpu.memory_space<vmem>>, vector<1x128xf32>
    %5 = vector.broadcast %4 : vector<1x128xf32> to vector<128x128xf32>
    %6 = arith.addf %3, %5 : vector<128x128xf32>
    %cst_7 = arith.constant 0.000000e+00 : f32
    %7 = vector.broadcast %cst_7 : f32 to vector<128x128xf32>
    %8 = arith.maximumf %6, %7 : vector<128x128xf32>
    %c0_8 = arith.constant 0 : index
    %c0_9 = arith.constant 0 : index
    %9 = vector.load %arg5[%c0_8, %c0_9] : memref<128x64xf32, #tpu.memory_space<vmem>>, vector<128x64xf32>
    %cst_10 = arith.constant dense<0.000000e+00> : vector<128x64xf32>
    %10 = tpu.matmul %8, %9, %cst_10 {dimension_numbers = #tpu.dot_dimension_numbers<[1], [0], [0], [1], [0, 0, 1, 1], [], []>} : vector<128x128xf32>, vector<128x64xf32>, vector<128x64xf32> -> vector<128x64xf32>
    %c0_11 = arith.constant 0 : index
    %c0_12 = arith.constant 0 : index
    %11 = vector.load %arg6[%c0_11, %c0_12] : memref<1x64xf32, #tpu.memory_space<vmem>>, vector<1x64xf32>
    %12 = vector.broadcast %11 : vector<1x64xf32> to vector<128x64xf32>
    %13 = arith.addf %10, %12 : vector<128x64xf32>
    %cst_13 = arith.constant 0.000000e+00 : f32
    %14 = vector.broadcast %cst_13 : f32 to vector<128x64xf32>
    %15 = arith.maximumf %13, %14 : vector<128x64xf32>
    %c0_14 = arith.constant 0 : index
    %c0_15 = arith.constant 0 : index
    %16 = vector.load %arg7[%c0_14, %c0_15] : memref<16x64xf32, #tpu.memory_space<vmem>>, vector<16x64xf32>
    %cst_16 = arith.constant dense<0.000000e+00> : vector<128x64xf32>
    %17 = tpu.matmul %1, %16, %cst_16 {dimension_numbers = #tpu.dot_dimension_numbers<[1], [0], [0], [1], [0, 0, 1, 1], [], []>} : vector<128x16xf32>, vector<16x64xf32>, vector<128x64xf32> -> vector<128x64xf32>
    %c0_17 = arith.constant 0 : index
    %c0_18 = arith.constant 0 : index
    %18 = vector.load %arg8[%c0_17, %c0_18] : memref<1x64xf32, #tpu.memory_space<vmem>>, vector<1x64xf32>
    %19 = vector.broadcast %18 : vector<1x64xf32> to vector<128x64xf32>
    %20 = arith.addf %17, %19 : vector<128x64xf32>
    %cst_19 = arith.constant 0.000000e+00 : f32
    %21 = vector.broadcast %cst_19 : f32 to vector<128x64xf32>
    %22 = arith.maximumf %20, %21 : vector<128x64xf32>
    %c0_20 = arith.constant 0 : index
    %c0_21 = arith.constant 0 : index
    %23 = vector.load %arg9[%c0_20, %c0_21] : memref<8x64xf32, #tpu.memory_space<vmem>>, vector<8x64xf32>
    %cst_22 = arith.constant dense<0.000000e+00> : vector<8x128xf32>
    %24 = tpu.matmul %23, %15, %cst_22 {dimension_numbers = #tpu.dot_dimension_numbers<[1], [1], [0], [0], [0, 0, 1, 0], [], []>} : vector<8x64xf32>, vector<128x64xf32>, vector<8x128xf32> -> vector<8x128xf32>
    %c0_23 = arith.constant 0 : index
    %c0_24 = arith.constant 0 : index
    %25 = vector.load %arg10[%c0_23, %c0_24] : memref<8x64xf32, #tpu.memory_space<vmem>>, vector<8x64xf32>
    %cst_25 = arith.constant dense<0.000000e+00> : vector<8x128xf32>
    %26 = tpu.matmul %25, %22, %cst_25 {dimension_numbers = #tpu.dot_dimension_numbers<[1], [1], [0], [0], [0, 0, 1, 0], [], []>} : vector<8x64xf32>, vector<128x64xf32>, vector<8x128xf32> -> vector<8x128xf32>
    %27 = arith.addf %24, %26 : vector<8x128xf32>
    %c0_26 = arith.constant 0 : index
    %c0_27 = arith.constant 0 : index
    %28 = vector.load %arg11[%c0_26, %c0_27] : memref<8x1xf32, #tpu.memory_space<vmem>>, vector<8x1xf32>
    %29 = vector.broadcast %28 : vector<8x1xf32> to vector<8x128xf32>
    %30 = arith.addf %27, %29 : vector<8x128xf32>
    %31 = tpu.iota {dimensions = array<i32: 0>} : vector<8x128xi32>
    %c2_i32 = arith.constant 2 : i32
    %32 = vector.broadcast %c2_i32 : i32 to vector<8x128xi32>
    %33 = arith.cmpi eq, %31, %32 : vector<8x128xi32>
    %34 = arith.negf %30 : vector<8x128xf32>
    %35 = math.exp %34 : vector<8x128xf32>
    %cst_28 = arith.constant 1.000000e+00 : f32
    %36 = vector.broadcast %cst_28 : f32 to vector<8x128xf32>
    %37 = arith.addf %36, %35 : vector<8x128xf32>
    %38 = arith.divf %36, %37 : vector<8x128xf32>
    %39 = arith.select %33, %38, %30 : vector<8x128xi1>, vector<8x128xf32>
    %c0_29 = arith.constant 0 : index
    %c0_30 = arith.constant 0 : index
    %40 = vector.load %arg12[%c0_29, %c0_30] : memref<8x128xf32, #tpu.memory_space<vmem>>, vector<8x128xf32>
    tpu.vector_store %arg12[%c0_29, %c0_30], %39 {strides = array<i32>} : memref<8x128xf32, #tpu.memory_space<vmem>>, vector<8x128xf32>,
    return
  }
  func.func @transform_0(%arg0: i32) -> (i32, i32) {
    %c0_i32 = arith.constant 0 : i32
    %c0_i32_0 = arith.constant 0 : i32
    return %arg0, %c0_i32 : i32, i32
  }
  func.func @transform_1(%arg0: i32) -> (i32, i32) {
    %c0_i32 = arith.constant 0 : i32
    %c0_i32_0 = arith.constant 0 : i32
    return %arg0, %c0_i32 : i32, i32
  }
  func.func @transform_2(%arg0: i32) -> (i32, i32) {
    %c0_i32 = arith.constant 0 : i32
    %c0_i32_0 = arith.constant 0 : i32
    %c0_i32_1 = arith.constant 0 : i32
    return %c0_i32, %c0_i32_0 : i32, i32
  }
  func.func @transform_3(%arg0: i32) -> (i32, i32) {
    %c0_i32 = arith.constant 0 : i32
    %c0_i32_0 = arith.constant 0 : i32
    %c0_i32_1 = arith.constant 0 : i32
    return %c0_i32, %c0_i32_0 : i32, i32
  }
  func.func @transform_4(%arg0: i32) -> (i32, i32) {
    %c0_i32 = arith.constant 0 : i32
    %c0_i32_0 = arith.constant 0 : i32
    %c0_i32_1 = arith.constant 0 : i32
    return %c0_i32, %c0_i32_0 : i32, i32
  }
  func.func @transform_5(%arg0: i32) -> (i32, i32) {
    %c0_i32 = arith.constant 0 : i32
    %c0_i32_0 = arith.constant 0 : i32
    %c0_i32_1 = arith.constant 0 : i32
    return %c0_i32, %c0_i32_0 : i32, i32
  }
  func.func @transform_6(%arg0: i32) -> (i32, i32) {
    %c0_i32 = arith.constant 0 : i32
    %c0_i32_0 = arith.constant 0 : i32
    %c0_i32_1 = arith.constant 0 : i32
    return %c0_i32, %c0_i32_0 : i32, i32
  }
  func.func @transform_7(%arg0: i32) -> (i32, i32) {
    %c0_i32 = arith.constant 0 : i32
    %c0_i32_0 = arith.constant 0 : i32
    %c0_i32_1 = arith.constant 0 : i32
    return %c0_i32, %c0_i32_0 : i32, i32
  }
  func.func @transform_8(%arg0: i32) -> (i32, i32) {
    %c0_i32 = arith.constant 0 : i32
    %c0_i32_0 = arith.constant 0 : i32
    %c0_i32_1 = arith.constant 0 : i32
    return %c0_i32, %c0_i32_0 : i32, i32
  }
  func.func @transform_9(%arg0: i32) -> (i32, i32) {
    %c0_i32 = arith.constant 0 : i32
    %c0_i32_0 = arith.constant 0 : i32
    %c0_i32_1 = arith.constant 0 : i32
    return %c0_i32, %c0_i32_0 : i32, i32
  }
  func.func @transform_10(%arg0: i32) -> (i32, i32) {
    %c0_i32 = arith.constant 0 : i32
    %c0_i32_0 = arith.constant 0 : i32
    %c0_i32_1 = arith.constant 0 : i32
    return %c0_i32, %c0_i32_0 : i32, i32
  }
  func.func @transform_11(%arg0: i32) -> (i32, i32) {
    %c0_i32 = arith.constant 0 : i32
    %c0_i32_0 = arith.constant 0 : i32
    return %c0_i32, %arg0 : i32, i32
  }
}

</mosaic_0001>

<bundles_post_ra>
// kernel: tpu_custom_call.1
= control target key start
LH: loop header
LB: loop body
LE: loop exit
PB: predicated region body
PF: predicated region fallthrough
CT: control target
= control target key end

     0   :  { %vm82_vm0 = vcmask 261120   ;;  %s1837_s0 = inlined_call_operand.vmem [shape: f32[128,32], index: 0, kind: input, shape index: {}]   ;;  %s1838_s1 = inlined_call_operand.vmem [shape: f32[128,16], index: 1, kind: input, shape index: {}]   ;;  %s1839_s2 = inlined_call_operand.vmem [shape: f32[32,128], index: 2, kind: input, shape index: {}]   ;;  %s1840_s3 = inlined_call_operand.vmem [shape: f32[1,128], index: 3, kind: input, shape index: {}]   ;;  %s1841_s4 = inlined_call_operand.vmem [shape: f32[128,64], index: 4, kind: input, shape index: {}]   ;;  %s1842_s5 = inlined_call_operand.vmem [shape: f32[1,64], index: 5, kind: input, shape index: {}]   ;;  %s1843_s6 = inlined_call_operand.vmem [shape: f32[16,64], index: 6, kind: input, shape index: {}]   ;;  %s1844_s7 = inlined_call_operand.vmem [shape: f32[1,64], index: 7, kind: input, shape index: {}]   ;;  %s1845_s8 = inlined_call_operand.vmem [shape: f32[8,64], index: 8, kind: input, shape index: {}]   ;;  %s1846_s9 = inlined_call_operand.vmem [shape: f32[8,64], index: 9, kind: input, shape index: {}]   ;;  %s1847_s10 = inlined_call_operand.vmem [shape: f32[8,1], index: 10, kind: input, shape index: {}]   ;;  %s1848_s11 = inlined_call_operand.hbm [shape: f32[8,128], index: 11, kind: output, shape index: {}]  }
   0x1   :  { %v71_v0 = vld [vmem:[%s1839_s2] sm:$0xff]  ;;  %v72_v1 = vld [vmem:[%s1839_s2 + $0x8] sm:$0xff]  ;;  %v73_v2 = vld [vmem:[%s1839_s2 + $0x10] sm:$0xff] }
   0x2   :  { %v1332_v3 = vpack.c.bf16 %v72_v1, %v71_v0  ;;  %v74_v4 = vld [vmem:[%s1839_s2 + $0x18] sm:$0xff]  ;;  %v39_v5 = vld [vmem:[%s1837_s0] sm:$0xff]  ;;  %v477_v8 = vld [vmem:[%s1843_s6 + $0x8] sm:$0xff] }
   0x3   :  { %v1336_v6 = vpack.c.bf16 %v74_v4, %v73_v2  ;;  %1154 = vmatprep.mubr.msk.f32.mxu0 %vm82_vm0, %v39_v5  ;;  %v476_v7 = vld [vmem:[%s1843_s6] sm:$0xff]  ;;  %v293_v10 = vld [vmem:[%s1841_s4 + $0x8] sm:$0xff]  ;;  %v294_v14 = vld [vmem:[%s1841_s4 + $0x10] sm:$0xff] }
   0x4   :  { %1333 = vmatprep.subr.bf16.mxu0 %v1332_v3  ;;  %v292_v9 = vld [vmem:[%s1841_s4] sm:$0xff]  ;;  %v40_v11 = vld [vmem:[%s1837_s0 + $0x8] sm:$0xff]  ;;  %v1372_v12 = vpack.c.bf16 %v477_v8, %v476_v7  ;;  %v295_v15 = vld [vmem:[%s1841_s4 + $0x18] sm:$0xff] }
   0x5   :  { %1335 = vmatpush3.bf16.msra.mxu0 %v1332_v3  ;;  %v1340_v13 = vpack.c.bf16 %v293_v10, %v292_v9  ;;  %v41_v16 = vld [vmem:[%s1837_s0 + $0x10] sm:$0xff]  ;;  %v1344_v17 = vpack.c.bf16 %v295_v15, %v294_v14  ;;  %v296_v18 = vld [vmem:[%s1841_s4 + $0x20] sm:$0xff]  ;;  %v297_v19 = vld [vmem:[%s1841_s4 + $0x28] sm:$0xff] }
   0x6   :  { %1337 = vmatprep.subr.bf16.mxu0 %v1336_v6  ;;  %v42_v20 = vld [vmem:[%s1837_s0 + $0x18] sm:$0xff]  ;;  %v1348_v21 = vpack.c.bf16 %v297_v19, %v296_v18 }
   0x7   :  { %1341 = vmatprep.subr.bf16.mxu1 %v1340_v13 }
   0x8   :  { %1343 = vmatpush3.bf16.msra.mxu1 %v1340_v13 }
   0x9   :  { %1339 = vmatpush3.bf16.msra.mxu0 %v1336_v6 }
   0xa   :  { %1373 = vmatprep.subr.bf16.mxu0 %v1372_v12 }
   0xc   :  { %1155 = vmatmul.mubr.msk.f32.vlgmr.msra.gmra.mrb[0].mxu0 %vm82_vm0, %v40_v11 }
   0xd   :  { %1157 = vmatprep.mubr.msk.f32.mxu0 %vm82_vm0, %v41_v16  ;;  %1375 = vmatpush3.bf16.msra.mxu0 %v1372_v12 }
   0xe   :  { %16 = vsyncpa [#allocation3], 0  ;;  %v43_v22 = vld [vmem:[%s1837_s0 + $0x20] sm:$0xff]  ;;  %1345 = vmatprep.subr.bf16.mxu1 %v1344_v17  ;;  %v298_v23 = vld [vmem:[%s1841_s4 + $0x30] sm:$0xff]  ;;  %vm485_vm1 = vcmask 130048   ;;  %vm697_vm2 = vcmask 523264  }
   0xf   :  { %v299_v24 = vld [vmem:[%s1841_s4 + $0x38] sm:$0xff]  ;;  %1347 = vmatpush3.bf16.msra.mxu1 %v1344_v17  ;;  %v44_v25 = vld [vmem:[%s1837_s0 + $0x28] sm:$0xff]  ;;  %v45_v27 = vld [vmem:[%s1837_s0 + $0x30] sm:$0xff]  ;;  %vm1475_vm4 = vmmov 0  }
  0x10   :  { %1158 = vmatmul.mubr.msk.f32.gmra.mrb[2].mxu0 %vm82_vm0, %v42_v20  ;;  %1349 = vmatprep.subr.bf16.mxu1 %v1348_v21  ;;  %v1352_v26 = vpack.c.bf16 %v299_v24, %v298_v23  ;;  %v300_v28 = vld [vmem:[%s1841_s4 + $0x40] sm:$0xff]  ;;  %v301_v29 = vld [vmem:[%s1841_s4 + $0x48] sm:$0xff]  ;;  %v46_v30 = vld [vmem:[%s1837_s0 + $0x38] sm:$0xff] }
  0x11   :  { %1160 = vmatprep.mubr.msk.f32.mxu0 %vm82_vm0, %v43_v22  ;;  %v1356_v31 = vpack.c.bf16 %v301_v29, %v300_v28  ;;  %v47_v32 = vld [vmem:[%s1837_s0 + $0x40] sm:$0xff]  ;;  %v302_v33 = vld [vmem:[%s1841_s4 + $0x50] sm:$0xff]  ;;  %v303_v34 = vld [vmem:[%s1841_s4 + $0x58] sm:$0xff] }
  0x12   :  { %v48_v35 = vld [vmem:[%s1837_s0 + $0x48] sm:$0xff]  ;;  %v1360_v36 = vpack.c.bf16 %v303_v34, %v302_v33  ;;  %v49_v37 = vld [vmem:[%s1837_s0 + $0x50] sm:$0xff]  ;;  %v304_v38 = vld [vmem:[%s1841_s4 + $0x60] sm:$0xff] }
  0x13   :  { %1351 = vmatpush3.bf16.msra.mxu1 %v1348_v21  ;;  %v305_v39 = vld [vmem:[%s1841_s4 + $0x68] sm:$0xff]  ;;  %v50_v40 = vld [vmem:[%s1837_s0 + $0x58] sm:$0xff]  ;;  %v51_v42 = vld [vmem:[%s1837_s0 + $0x60] sm:$0xff] }
  0x14   :  { %1161 = vmatmul.mubr.msk.f32.gmra.mrb[4].mxu0 %vm82_vm0, %v44_v25  ;;  %1353 = vmatprep.subr.bf16.mxu1 %v1352_v26  ;;  %v1364_v41 = vpack.c.bf16 %v305_v39, %v304_v38  ;;  %v52_v43 = vld [vmem:[%s1837_s0 + $0x68] sm:$0xff]  ;;  %v53_v44 = vld [vmem:[%s1837_s0 + $0x70] sm:$0xff]  ;;  %v54_v45 = vld [vmem:[%s1837_s0 + $0x78] sm:$0xff] }
  0x15   :  { %1163 = vmatprep.mubr.msk.f32.mxu0 %vm82_vm0, %v45_v27  ;;  %v306_v46 = vld [vmem:[%s1841_s4 + $0x70] sm:$0xff]  ;;  %v307_v47 = vld [vmem:[%s1841_s4 + $0x78] sm:$0xff]  ;;  %v55_v49 = vld [vmem:[%s1838_s1] sm:$0xff] }
  0x16   :  { %v1368_v48 = vpack.c.bf16 %v307_v47, %v306_v46  ;;  %v56_v50 = vld [vmem:[%s1838_s1 + $0x8] sm:$0xff]  ;;  %v57_v51 = vld [vmem:[%s1838_s1 + $0x10] sm:$0xff]  ;;  %v58_v52 = vld [vmem:[%s1838_s1 + $0x18] sm:$0xff] }
  0x17   :  { %1355 = vmatpush3.bf16.msra.mxu1 %v1352_v26  ;;  %v59_v53 = vld [vmem:[%s1838_s1 + $0x20] sm:$0xff]  ;;  %v60_v54 = vld [vmem:[%s1838_s1 + $0x28] sm:$0xff]  ;;  %v61_v55 = vld [vmem:[%s1838_s1 + $0x30] sm:$0xff] }
  0x18   :  { %1164 = vmatmul.mubr.msk.f32.gmra.mrb[6].mxu0 %vm82_vm0, %v46_v30  ;;  %1357 = vmatprep.subr.bf16.mxu1 %v1356_v31  ;;  %v62_v56 = vld [vmem:[%s1838_s1 + $0x38] sm:$0xff]  ;;  %v63_v57 = vld [vmem:[%s1838_s1 + $0x40] sm:$0xff]  ;;  %v64_v58 = vld [vmem:[%s1838_s1 + $0x48] sm:$0xff] }
  0x19   :  { %1166 = vmatprep.mubr.msk.f32.mxu0 %vm82_vm0, %v47_v32  ;;  %v65_v59 = vld [vmem:[%s1838_s1 + $0x50] sm:$0xff]  ;;  %v66_v60 = vld [vmem:[%s1838_s1 + $0x58] sm:$0xff]  ;;  %v67_v61 = vld [vmem:[%s1838_s1 + $0x60] sm:$0xff] }
  0x1a   :  { %v68_v62 = vld [vmem:[%s1838_s1 + $0x68] sm:$0xff]  ;;  %v69_v63 = vld [vmem:[%s1838_s1 + $0x70] sm:$0xff]  ;;  %v70_v0 = vld [vmem:[%s1838_s1 + $0x78] sm:$0xff] }
  0x1b   :  { %1359 = vmatpush3.bf16.msra.mxu1 %v1356_v31  ;;  %v972_v1 = vld [vmem:[%s1840_s3] ss:$0 sm:$0xff]  ;;  %vm1746_vm3 = vmpackc.low %vm697_vm2, %vm697_vm2 }
  0x1c   :  { %1167 = vmatmul.mubr.msk.f32.gmra.mrb[8].mxu0 %vm82_vm0, %v48_v35  ;;  %1361 = vmatprep.subr.bf16.mxu1 %v1360_v36 }
  0x1d   :  { %1169 = vmatprep.mubr.msk.f32.mxu0 %vm82_vm0, %v49_v37 }
  0x1f   :  { %1363 = vmatpush3.bf16.msra.mxu1 %v1360_v36 }
  0x20   :  { %1170 = vmatmul.mubr.msk.f32.gmra.mrb[10].mxu0 %vm82_vm0, %v50_v40  ;;  %1365 = vmatprep.subr.bf16.mxu1 %v1364_v41 }
  0x21   :  { %1172 = vmatprep.mubr.msk.f32.mxu0 %vm82_vm0, %v51_v42 }
  0x23   :  { %1367 = vmatpush3.bf16.msra.mxu1 %v1364_v41 }
  0x24   :  { %1173 = vmatmul.mubr.msk.f32.gmra.mrb[12].mxu0 %vm82_vm0, %v52_v43  ;;  %1369 = vmatprep.subr.bf16.mxu1 %v1368_v48 }
  0x25   :  { %1175 = vmatprep.mubr.msk.f32.mxu0 %vm82_vm0, %v53_v44 }
  0x27   :  { %1371 = vmatpush3.bf16.msra.mxu1 %v1368_v48 }
  0x28   :  { %1176 = vmatmul.mubr.msk.f32.gmra.mrb[14].mxu0 %vm82_vm0, %v54_v45 }
  0x29   :  { %1238 = vmatprep.mubr.msk.f32.mxu0 %vm485_vm1, %v55_v49 }
  0x2c   :  { %1239 = vmatmul.mubr.msk.f32.vlgmr.msra.gmra.mrb[16].mxu0 %vm485_vm1, %v56_v50  ;;  %v1739_v50 = vld [vmem:[%s1844_s7] ss:$0 sm:$0xff] }
  0x2d   :  { %1241 = vmatprep.mubr.msk.f32.mxu0 %vm485_vm1, %v57_v51 }
  0x30   :  { %1242 = vmatmul.mubr.msk.f32.gmra.mrb[18].mxu0 %vm485_vm1, %v58_v52 }
  0x31   :  { %1244 = vmatprep.mubr.msk.f32.mxu0 %vm485_vm1, %v59_v53 }
  0x34   :  { %1245 = vmatmul.mubr.msk.f32.gmra.mrb[20].mxu0 %vm485_vm1, %v60_v54 }
  0x35   :  { %1247 = vmatprep.mubr.msk.f32.mxu0 %vm485_vm1, %v61_v55 }
  0x38   :  { %1248 = vmatmul.mubr.msk.f32.gmra.mrb[22].mxu0 %vm485_vm1, %v62_v56 }
  0x39   :  { %1250 = vmatprep.mubr.msk.f32.mxu0 %vm485_vm1, %v63_v57 }
  0x3c   :  { %1251 = vmatmul.mubr.msk.f32.gmra.mrb[24].mxu0 %vm485_vm1, %v64_v58  ;;  %v1474_v58 = vmov 0.0|0.0  }
  0x3d   :  { %1253 = vmatprep.mubr.msk.f32.mxu0 %vm485_vm1, %v65_v59  ;;  %1376 = vmatprep.subr.bf16.mxu1 %v1474_v58  ;;  %v947_v59 = vlaneseq }
  0x3e   :  { %1408 = vmatprep.subr.bf16.mxu0 %v1474_v58 }
  0x40   :  { %1254 = vmatmul.mubr.msk.f32.gmra.mrb[26].mxu0 %vm485_vm1, %v66_v60 }
  0x41   :  { %1256 = vmatprep.mubr.msk.f32.mxu0 %vm485_vm1, %v67_v61 }
  0x44   :  { %1257 = vmatmul.mubr.msk.f32.gmra.mrb[28].mxu0 %vm485_vm1, %v68_v62 }
  0x45   :  { %1259 = vmatprep.mubr.msk.f32.mxu0 %vm485_vm1, %v69_v63 }
  0x48   :  { %1260 = vmatmul.mubr.msk.f32.gmra.mrb[30].mxu0 %vm485_vm1, %v70_v0 }
  0xdf   :  { %v1156_v2 = vpop.f32.mrb[0].mxu0 }
  0xe0   :  { %v203_v3 = vadd.f32 %v1156_v2, %v972_v1  ;;  %v197_v4 = vpop.f32.mrb[1].mxu0 }
  0xe1   :  { %v198_v5 = vadd.f32 %v972_v1, %v197_v4 }
  0xe2   :  { %v277_v8 = vmax.f32 %v203_v3, 0.0 }
  0xe3   :  { %v1159_v6 = vpop.f32.mrb[2].mxu0  ;;  %v276_v7 = vmax.f32 %v198_v5, 0.0 }
  0xe4   :  { %v213_v9 = vadd.f32 %v1159_v6, %v972_v1  ;;  %v207_v10 = vpop.f32.mrb[3].mxu0 }
  0xe5   :  { %v208_v11 = vadd.f32 %v972_v1, %v207_v10  ;;  %1210 = vmatprep.mubr.f32.mxu1 %v276_v7 }
  0xe6   :  { %v279_v12 = vmax.f32 %v213_v9, 0.0  ;;  %1211 = vmatmul.mubr.f32.vlgmr.msra.gmra.mrb[0].mxu1 %v277_v8 }
  0xe7   :  { %v278_v13 = vmax.f32 %v208_v11, 0.0  ;;  %v1162_v14 = vpop.f32.mrb[4].mxu0 }
  0xe8   :  { %v223_v15 = vadd.f32 %v1162_v14, %v972_v1  ;;  %v217_v16 = vpop.f32.mrb[5].mxu0 }
  0xe9   :  { %1213 = vmatprep.mubr.f32.mxu1 %v278_v13  ;;  %v218_v17 = vadd.f32 %v972_v1, %v217_v16 }
  0xea   :  { %1214 = vmatmul.mubr.f32.gmra.mrb[2].mxu1 %v279_v12  ;;  %v281_v18 = vmax.f32 %v223_v15, 0.0 }
  0xeb   :  { %v280_v19 = vmax.f32 %v218_v17, 0.0  ;;  %v1165_v20 = vpop.f32.mrb[6].mxu0 }
  0xec   :  { %v233_v21 = vadd.f32 %v1165_v20, %v972_v1  ;;  %v227_v22 = vpop.f32.mrb[7].mxu0 }
  0xed   :  { %1216 = vmatprep.mubr.f32.mxu1 %v280_v19  ;;  %v228_v23 = vadd.f32 %v972_v1, %v227_v22 }
  0xee   :  { %1217 = vmatmul.mubr.f32.gmra.mrb[4].mxu1 %v281_v18  ;;  %v283_v24 = vmax.f32 %v233_v21, 0.0 }
  0xef   :  { %v282_v25 = vmax.f32 %v228_v23, 0.0  ;;  %v1168_v26 = vpop.f32.mrb[8].mxu0 }
  0xf0   :  { %v243_v27 = vadd.f32 %v1168_v26, %v972_v1  ;;  %v237_v28 = vpop.f32.mrb[9].mxu0 }
  0xf1   :  { %1219 = vmatprep.mubr.f32.mxu1 %v282_v25  ;;  %v238_v29 = vadd.f32 %v972_v1, %v237_v28 }
  0xf2   :  { %1220 = vmatmul.mubr.f32.gmra.mrb[6].mxu1 %v283_v24  ;;  %v285_v30 = vmax.f32 %v243_v27, 0.0 }
  0xf3   :  { %v284_v31 = vmax.f32 %v238_v29, 0.0  ;;  %v1171_v32 = vpop.f32.mrb[10].mxu0 }
  0xf4   :  { %v253_v33 = vadd.f32 %v1171_v32, %v972_v1  ;;  %v247_v34 = vpop.f32.mrb[11].mxu0 }
  0xf5   :  { %1222 = vmatprep.mubr.f32.mxu1 %v284_v31  ;;  %v248_v35 = vadd.f32 %v972_v1, %v247_v34 }
  0xf6   :  { %1223 = vmatmul.mubr.f32.gmra.mrb[8].mxu1 %v285_v30  ;;  %v287_v36 = vmax.f32 %v253_v33, 0.0 }
  0xf7   :  { %v286_v37 = vmax.f32 %v248_v35, 0.0  ;;  %v1174_v38 = vpop.f32.mrb[12].mxu0 }
  0xf8   :  { %v263_v39 = vadd.f32 %v1174_v38, %v972_v1  ;;  %v257_v40 = vpop.f32.mrb[13].mxu0 }
  0xf9   :  { %1225 = vmatprep.mubr.f32.mxu1 %v286_v37  ;;  %v258_v41 = vadd.f32 %v972_v1, %v257_v40 }
  0xfa   :  { %1226 = vmatmul.mubr.f32.gmra.mrb[10].mxu1 %v287_v36  ;;  %v289_v42 = vmax.f32 %v263_v39, 0.0 }
  0xfb   :  { %v288_v43 = vmax.f32 %v258_v41, 0.0  ;;  %v1177_v44 = vpop.f32.mrb[14].mxu0 }
  0xfc   :  { %v273_v45 = vadd.f32 %v1177_v44, %v972_v1  ;;  %v267_v46 = vpop.f32.mrb[15].mxu0 }
  0xfd   :  { %1228 = vmatprep.mubr.f32.mxu1 %v288_v43  ;;  %v268_v47 = vadd.f32 %v972_v1, %v267_v46  ;;  %v696_v46 = vld [vmem:[%s1846_s9] sm:$0xff] }
  0xfe   :  { %1229 = vmatmul.mubr.f32.gmra.mrb[12].mxu1 %v289_v42  ;;  %v291_v48 = vmax.f32 %v273_v45, 0.0  ;;  %v1476_v45 = vmov 0.0  }
  0xff   :  { %v290_v49 = vmax.f32 %v268_v47, 0.0  ;;  %v1240_v51 = vpop.f32.mrb[16].mxu0  ;;  %1329 = vmatprep.mubr.msk.f32.mxu0 %vm1475_vm4, %v1476_v45  ;;  %v940_v47 = vld [vmem:[%s1847_s10] sm:$0xff]  ;;  %s1478_s10 = smov [#allocation2]  }
 0x100   :  { %v606_v52 = vadd.f32 %v1240_v51, %v1739_v50  ;;  %v600_v53 = vpop.f32.mrb[17].mxu0  ;;  %s964_s23 = sshll.u32 %s1478_s10, 4  ;;  %s965_s23 = int_to_ptr.vmem [resolvable:$true] %s964_s23 }
 0x101   :  { %1231 = vmatprep.mubr.f32.mxu1 %v290_v49  ;;  %v601_v54 = vadd.f32 %v1739_v50, %v600_v53  ;;  %v989_v49 = vld [vmem:[%s1842_s5] ss:$0 sm:$0xff]  ;;  %p1455_p1 = scmp.lt.s32.totalorder %s965_s23, %s965_s23 }
 0x102   :  { %1232 = vmatmul.mubr.f32.gmra.mrb[14].mxu1 %v291_v48  ;;  %v680_v55 = vmax.f32 %v606_v52, 0.0  ;;  %v1477_v48 = vmov 0  }
 0x103   :  { %v679_v56 = vmax.f32 %v601_v54, 0.0  ;;  %v1243_v60 = vpop.f32.mrb[18].mxu0  ;;  %1294 = vmatprep.mubr.msk.f32.mxu1 %vm1475_vm4, %v1476_v45  ;;  %1445 = vset.pattern.permute.xlu0 %v1477_v48 }
 0x104   :  { %v610_v61 = vpop.f32.mrb[19].mxu0  ;;  %v616_v62 = vadd.f32 %v1243_v60, %v1739_v50  ;;  %943 = vperm.xlu0 %1445, %v940_v47  }
 0x105   :  { %v1377_v57 = vpack.c.bf16 %v680_v55, %v679_v56  ;;  %v611_v63 = vadd.f32 %v1739_v50, %v610_v61 }
 0x106   :  { %v682_v0 = vmax.f32 %v616_v62, 0.0 }
 0x107   :  { %1379 = vmatpush3.bf16.xpose.msk.msra.mxu1 %vm1746_vm3, %v1377_v57  ;;  %v681_v1 = vmax.f32 %v611_v63, 0.0  ;;  %v1246_v3 = vpop.f32.mrb[20].mxu0 }
 0x108   :  { %1380 = vmatprep.subr.bf16.mxu1 %v1474_v58  ;;  %v626_v4 = vadd.f32 %v1246_v3, %v1739_v50  ;;  %v620_v5 = vpop.f32.mrb[21].mxu0 }
 0x109   :  { %v1381_v2 = vpack.c.bf16 %v682_v0, %v681_v1  ;;  %v621_v6 = vadd.f32 %v1739_v50, %v620_v5 }
 0x10a   :  { %v684_v7 = vmax.f32 %v626_v4, 0.0 }
 0x10b   :  { %v683_v8 = vmax.f32 %v621_v6, 0.0  ;;  %v1249_v9 = vpop.f32.mrb[22].mxu0 }
 0x10c   :  { %v636_v10 = vadd.f32 %v1249_v9, %v1739_v50  ;;  %v630_v11 = vpop.f32.mrb[23].mxu0 }
 0x10d   :  { %v1385_v12 = vpack.c.bf16 %v684_v7, %v683_v8  ;;  %v631_v13 = vadd.f32 %v1739_v50, %v630_v11 }
 0x10e   :  { %v686_v14 = vmax.f32 %v636_v10, 0.0 }
 0x10f   :  { %1383 = vmatpush3.bf16.xpose.msk.msra.mxu1 %vm1746_vm3, %v1381_v2  ;;  %v685_v15 = vmax.f32 %v631_v13, 0.0  ;;  %v1252_v17 = vpop.f32.mrb[24].mxu0 }
 0x110   :  { %1384 = vmatprep.subr.bf16.mxu1 %v1474_v58  ;;  %v646_v18 = vadd.f32 %v1252_v17, %v1739_v50  ;;  %v640_v19 = vpop.f32.mrb[25].mxu0 }
 0x111   :  { %v1389_v16 = vpack.c.bf16 %v686_v14, %v685_v15  ;;  %v641_v20 = vadd.f32 %v1739_v50, %v640_v19 }
 0x112   :  { %v688_v21 = vmax.f32 %v646_v18, 0.0 }
 0x113   :  { %v687_v22 = vmax.f32 %v641_v20, 0.0  ;;  %v1255_v24 = vpop.f32.mrb[26].mxu0 }
 0x114   :  { %v656_v25 = vadd.f32 %v1255_v24, %v1739_v50  ;;  %v650_v26 = vpop.f32.mrb[27].mxu0 }
 0x115   :  { %v1393_v23 = vpack.c.bf16 %v688_v21, %v687_v22  ;;  %v651_v27 = vadd.f32 %v1739_v50, %v650_v26 }
 0x116   :  { %v690_v28 = vmax.f32 %v656_v25, 0.0 }
 0x117   :  { %1387 = vmatpush3.bf16.xpose.msk.msra.mxu1 %vm1746_vm3, %v1385_v12  ;;  %v689_v29 = vmax.f32 %v651_v27, 0.0  ;;  %v1258_v31 = vpop.f32.mrb[28].mxu0 }
 0x118   :  { %1388 = vmatprep.subr.bf16.mxu1 %v1474_v58  ;;  %v666_v32 = vadd.f32 %v1258_v31, %v1739_v50  ;;  %v660_v33 = vpop.f32.mrb[29].mxu0 }
 0x119   :  { %v1397_v30 = vpack.c.bf16 %v690_v28, %v689_v29  ;;  %v661_v34 = vadd.f32 %v1739_v50, %v660_v33 }
 0x11a   :  { %v692_v35 = vmax.f32 %v666_v32, 0.0 }
 0x11b   :  { %v691_v36 = vmax.f32 %v661_v34, 0.0  ;;  %v1261_v38 = vpop.f32.mrb[30].mxu0 }
 0x11c   :  { %v676_v39 = vadd.f32 %v1261_v38, %v1739_v50  ;;  %v670_v40 = vpop.f32.mrb[31].mxu0 }
 0x11d   :  { %v1401_v37 = vpack.c.bf16 %v692_v35, %v691_v36  ;;  %v671_v41 = vadd.f32 %v1739_v50, %v670_v40 }
 0x11e   :  { %v694_v42 = vmax.f32 %v676_v39, 0.0 }
 0x11f   :  { %1391 = vmatpush3.bf16.xpose.msk.msra.mxu1 %vm1746_vm3, %v1389_v16  ;;  %v693_v43 = vmax.f32 %v671_v41, 0.0 }
 0x120   :  { %1392 = vmatprep.subr.bf16.mxu1 %v1474_v58 }
 0x121   :  { %v1405_v44 = vpack.c.bf16 %v694_v42, %v693_v43 }
 0x127   :  { %1395 = vmatpush3.bf16.xpose.msk.msra.mxu1 %vm1746_vm3, %v1393_v23 }
 0x128   :  { %1396 = vmatprep.subr.bf16.mxu1 %v1474_v58 }
 0x12f   :  { %1399 = vmatpush3.bf16.xpose.msk.msra.mxu1 %vm1746_vm3, %v1397_v30 }
 0x130   :  { %1400 = vmatprep.subr.bf16.mxu1 %v1474_v58 }
 0x137   :  { %1403 = vmatpush3.bf16.xpose.msk.msra.mxu1 %vm1746_vm3, %v1401_v37 }
 0x138   :  { %1404 = vmatprep.subr.bf16.mxu1 %v1474_v58 }
 0x13f   :  { %1407 = vmatpush3.bf16.xpose.msk.msra.mxu1 %vm1746_vm3, %v1405_v44  ;;  %v695_v44 = vld [vmem:[%s1845_s8] sm:$0xff]  ;;  %s1450_s8 = scalar_lea.vmem %s965_s23, 128 }
 0x140   :  { %p1451_p0 = scmp.ne.s32.totalorder %s965_s23, %s1450_s8  ;;  %p1456_p2 = scmp.lt.s32.totalorder %s1450_s8, %s1450_s8 }
 0x142   :  { %p1457_p3 = por %p1456_p2, %p1455_p1 }
 0x144   :  { %p1458_p4 = pnand %p1457_p3, %p1451_p0 }
 0x146   :  { %1295 = vmatmul.mubr.msk.f32.vlgmr.msra.gmra.mrb[16].mxu1 %vm697_vm2, %v696_v46 }
 0x183   :  { %v944_v48 = vpop.permute.xlu0 %943 }
 0x1b9   :  { %v1212_v50 = vpop.f32.mrb[0].mxu1 }
 0x1ba   :  { %v387_v51 = vadd.f32 %v1212_v50, %v989_v49  ;;  %v381_v52 = vpop.f32.mrb[1].mxu1 }
 0x1bb   :  { %v382_v53 = vadd.f32 %v989_v49, %v381_v52 }
 0x1bc   :  { %v461_v54 = vmax.f32 %v387_v51, 0.0 }
 0x1bd   :  { %v460_v55 = vmax.f32 %v382_v53, 0.0  ;;  %v1215_v56 = vpop.f32.mrb[2].mxu1 }
 0x1be   :  { %v397_v57 = vadd.f32 %v1215_v56, %v989_v49  ;;  %v391_v60 = vpop.f32.mrb[3].mxu1 }
 0x1bf   :  { %v1409_v61 = vpack.c.bf16 %v461_v54, %v460_v55  ;;  %v392_v62 = vadd.f32 %v989_v49, %v391_v60  ;;  %v948_v54 = vshrl.u32 %v947_v59, 7 }
 0x1c0   :  { %v463_v63 = vmax.f32 %v397_v57, 0.0 }
 0x1c1   :  { %v462_v0 = vmax.f32 %v392_v62, 0.0  ;;  %1411 = vmatpush3.bf16.xpose.msk.msra.mxu0 %vm1746_vm3, %v1409_v61  ;;  %v1218_v1 = vpop.f32.mrb[4].mxu1  ;;  %vm949_vm5 = vcmp.eq.s32.totalorder %v948_v54, 2 }
 0x1c2   :  { %v407_v2 = vadd.f32 %v1218_v1, %v989_v49  ;;  %v401_v3 = vpop.f32.mrb[5].mxu1  ;;  %1412 = vmatprep.subr.bf16.mxu0 %v1474_v58 }
 0x1c3   :  { %v1413_v4 = vpack.c.bf16 %v463_v63, %v462_v0  ;;  %v402_v5 = vadd.f32 %v989_v49, %v401_v3 }
 0x1c4   :  { %v465_v6 = vmax.f32 %v407_v2, 0.0 }
 0x1c5   :  { %v464_v7 = vmax.f32 %v402_v5, 0.0  ;;  %v1221_v8 = vpop.f32.mrb[6].mxu1 }
 0x1c6   :  { %v417_v9 = vadd.f32 %v1221_v8, %v989_v49  ;;  %v411_v10 = vpop.f32.mrb[7].mxu1 }
 0x1c7   :  { %v1417_v11 = vpack.c.bf16 %v465_v6, %v464_v7  ;;  %v412_v12 = vadd.f32 %v989_v49, %v411_v10 }
 0x1c8   :  { %v467_v13 = vmax.f32 %v417_v9, 0.0 }
 0x1c9   :  { %1415 = vmatpush3.bf16.xpose.msk.msra.mxu0 %vm1746_vm3, %v1413_v4  ;;  %v466_v14 = vmax.f32 %v412_v12, 0.0  ;;  %v1224_v15 = vpop.f32.mrb[8].mxu1 }
 0x1ca   :  { %1416 = vmatprep.subr.bf16.mxu0 %v1474_v58  ;;  %v427_v16 = vadd.f32 %v1224_v15, %v989_v49  ;;  %v421_v17 = vpop.f32.mrb[9].mxu1 }
 0x1cb   :  { %v1421_v18 = vpack.c.bf16 %v467_v13, %v466_v14  ;;  %v422_v19 = vadd.f32 %v989_v49, %v421_v17 }
 0x1cc   :  { %v469_v20 = vmax.f32 %v427_v16, 0.0 }
 0x1cd   :  { %v468_v21 = vmax.f32 %v422_v19, 0.0  ;;  %v1227_v22 = vpop.f32.mrb[10].mxu1 }
 0x1ce   :  { %v437_v23 = vadd.f32 %v1227_v22, %v989_v49  ;;  %v431_v24 = vpop.f32.mrb[11].mxu1 }
 0x1cf   :  { %v1425_v25 = vpack.c.bf16 %v469_v20, %v468_v21  ;;  %v432_v26 = vadd.f32 %v989_v49, %v431_v24 }
 0x1d0   :  { %v471_v27 = vmax.f32 %v437_v23, 0.0 }
 0x1d1   :  { %1419 = vmatpush3.bf16.xpose.msk.msra.mxu0 %vm1746_vm3, %v1417_v11  ;;  %v470_v28 = vmax.f32 %v432_v26, 0.0  ;;  %v1230_v29 = vpop.f32.mrb[12].mxu1 }
 0x1d2   :  { %1420 = vmatprep.subr.bf16.mxu0 %v1474_v58  ;;  %v447_v30 = vadd.f32 %v1230_v29, %v989_v49  ;;  %v441_v31 = vpop.f32.mrb[13].mxu1 }
 0x1d3   :  { %v1429_v32 = vpack.c.bf16 %v471_v27, %v470_v28  ;;  %v442_v33 = vadd.f32 %v989_v49, %v441_v31 }
 0x1d4   :  { %v473_v34 = vmax.f32 %v447_v30, 0.0 }
 0x1d5   :  { %v472_v35 = vmax.f32 %v442_v33, 0.0  ;;  %v1233_v36 = vpop.f32.mrb[14].mxu1 }
 0x1d6   :  { %v457_v37 = vadd.f32 %v1233_v36, %v989_v49  ;;  %v451_v38 = vpop.f32.mrb[15].mxu1 }
 0x1d7   :  { %v1433_v39 = vpack.c.bf16 %v473_v34, %v472_v35  ;;  %v452_v40 = vadd.f32 %v989_v49, %v451_v38 }
 0x1d8   :  { %v475_v41 = vmax.f32 %v457_v37, 0.0 }
 0x1d9   :  { %1423 = vmatpush3.bf16.xpose.msk.msra.mxu0 %vm1746_vm3, %v1421_v18  ;;  %v474_v42 = vmax.f32 %v452_v40, 0.0 }
 0x1da   :  { %1424 = vmatprep.subr.bf16.mxu0 %v1474_v58 }
 0x1db   :  { %v1437_v43 = vpack.c.bf16 %v475_v41, %v474_v42 }
 0x1e1   :  { %1427 = vmatpush3.bf16.xpose.msk.msra.mxu0 %vm1746_vm3, %v1425_v25 }
 0x1e2   :  { %1428 = vmatprep.subr.bf16.mxu0 %v1474_v58 }
 0x1e9   :  { %1431 = vmatpush3.bf16.xpose.msk.msra.mxu0 %vm1746_vm3, %v1429_v32 }
 0x1ea   :  { %1432 = vmatprep.subr.bf16.mxu0 %v1474_v58 }
 0x1f1   :  { %1435 = vmatpush3.bf16.xpose.msk.msra.mxu0 %vm1746_vm3, %v1433_v39 }
 0x1f2   :  { %1436 = vmatprep.subr.bf16.mxu0 %v1474_v58 }
 0x1f9   :  { %1439 = vmatpush3.bf16.xpose.msk.msra.mxu0 %vm1746_vm3, %v1437_v43 }
 0x200   :  { %1330 = vmatmul.mubr.msk.f32.vlgmr.msra.gmra.mrb[32].mxu0 %vm697_vm2, %v695_v44 }
 0x219   :  { %v815_v45 = vpop.f32.mrb[16].mxu1 }
 0x21a   :  { %v1296_v46 = vpop.f32.mrb[17].mxu1 }
 0x2d3   :  { %v936_v47 = vpop.f32.mrb[32].mxu0 }
 0x2d4   :  { %v937_v49 = vadd.f32 %v936_v47, %v815_v45  ;;  %v1331_v50 = vpop.f32.mrb[33].mxu0 }
 0x2d6   :  { %v946_v51 = vadd.f32 %v944_v48, %v937_v49 }
 0x2d8   :  { %v1041_v52 = vmul.f32 -1.442695, %v946_v51 }
 0x2da   :  { %1446 = vpow2.f32 %v1041_v52 }
 0x2e4   :  { %v1447_v53 = vpop.eup %1446 }
 0x2e5   :  { %v953_v58 = vadd.f32 1.0, %v1447_v53 }
 0x2e7   :  { %1448 = vrcp.f32 %v953_v58 }
 0x2f1   :  { %v1449_v55 = vpop.eup %1448 }
 0x2f2   :  { %v956_v56 = vsel %vm949_vm5, %v1449_v55, %v946_v51 }
 0x2f3   :  { %957 = vst [vmem:[#allocation2] sm:$0xff] %v956_v56 }
 0x2f4   :  { %1461 = shalt.err (!%p1458_p4)
}
 0x2f5   :  { %s1462_s26 = scalar_lea.hbm %s1848_s11, 128 }
 0x2f6   :  { %p1463_p5 = scmp.ne.s32.totalorder %s1848_s11, %s1462_s26  ;;  %p1466_p6 = scmp.lt.u32.totalorder %s1462_s26, %s1848_s11 }
 0x2f8   :  { %p1468_p7 = pnand %p1466_p6, %p1463_p5 }
 0x2fa   :  { %1471 = shalt.err (!%p1468_p7)
}
 0x2fb   :  { %967 = dma.vmem_to_hbm [thread:$0]  %s965_s23, 128, %s1848_s11, [#allocation3]  }
 0x2fc   :  { %1472 = dma.done.wait [#allocation3], 128  }
 0x2fd   :  { %1473 = vsyncadd [#allocation3], 4294967168 }
 0x2fe   :  { %971 = vsyncpa [#allocation3], 1 }

</bundles_post_ra>
